<compile_context>
chip_gen: v7x
topology: tpu7x:2x2x1
jax: 0.10.0
libtpu: 0.0.40
codegen_flags: <defaults>
</compile_context>

<pallas_src>
import jax
import jax.numpy as jnp
from jax.experimental import pallas as pl
from jax.experimental.pallas import tpu as pltpu


def _round_up(x, m):
    return ((x + m - 1) // m) * m


def _pad_axis(x, axis, new_size):
    pad = new_size - x.shape[axis]
    if pad == 0:
        return x
    widths = [(0, 0)] * x.ndim
    widths[axis] = (0, pad)
    return jnp.pad(x, widths)


# Lane padding for the vocab axes.  256 = v6e/v7x MXU tile width (128 is
# sufficient on v5e).
LANE_PAD = 256


# ---------------------------------------------------------------------------
# VMEM limit / weight-buffering helpers
# ---------------------------------------------------------------------------
_VMEM_LIMIT_CACHE = None


def _default_vmem_limit():
    """Scoped-VMEM limit: well above the 16/32 MiB defaults, well below the
    physical capacity (64 MiB/TC on v7x, 128 MiB on v5e/v6e)."""
    global _VMEM_LIMIT_CACHE
    if _VMEM_LIMIT_CACHE is None:
        try:
            cap = int(pltpu.get_tpu_info().vmem_capacity_bytes)
        except Exception:
            cap = 64 * 1024 * 1024
        _VMEM_LIMIT_CACHE = int(min(100 * 1024 * 1024, (cap * 3) // 4))
    return _VMEM_LIMIT_CACHE


_SINGLE_BUFFERED_WEIGHTS = None


def _probe_single_buffering():
    """pl.Buffered(1) stops the pipeline from double-buffering constant-index
    weight blocks (halves their VMEM footprint - matters most on v7x's 64 MiB).
    Feature-probe it so the script still compiles on JAX builds where
    pipeline_mode is not supported on the TPU pallas_call path."""
    def _copy_kernel(x_ref, o_ref):
        o_ref[...] = x_ref[...]
    try:
        x = jnp.zeros((8, 128), jnp.float32)
        y = pl.pallas_call(
            _copy_kernel,
            out_shape=jax.ShapeDtypeStruct((8, 128), jnp.float32),
            grid=(1,),
            in_specs=[pl.BlockSpec((8, 128), lambda i: (0, 0),
                                   pipeline_mode=pl.Buffered(1))],
            out_specs=pl.BlockSpec((8, 128), lambda i: (0, 0)),
        )(x)
        jax.block_until_ready(y)
        return True
    except Exception:
        return False


def _use_single_buffered_weights():
    global _SINGLE_BUFFERED_WEIGHTS
    if _SINGLE_BUFFERED_WEIGHTS is None:
        _SINGLE_BUFFERED_WEIGHTS = _probe_single_buffering()
    return _SINGLE_BUFFERED_WEIGHTS


def _const_spec(shape):
    """BlockSpec for an operand whose block index never changes across the
    grid (weights / biases): single-buffered when supported."""
    n = len(shape)
    index_map = lambda *_: (0,) * n
    if _use_single_buffered_weights():
        return pl.BlockSpec(shape, index_map, pipeline_mode=pl.Buffered(1))
    return pl.BlockSpec(shape, index_map)


# ---------------------------------------------------------------------------
# Kernel 1: fused linear + tanh      y = tanh(x @ w + b)
# Row-tiled, "parallel" grid; bf16 MXU operands, f32 accumulation.
# ---------------------------------------------------------------------------
def _linear_tanh_kernel(x_ref, w_ref, b_ref, o_ref):
    y = jnp.dot(x_ref[...], w_ref[...], preferred_element_type=jnp.float32)
    o_ref[...] = jnp.tanh(y + b_ref[...]).astype(o_ref.dtype)


def linear_tanh(x, w, b, *, tile_m=512, out_dtype=jnp.bfloat16,
                vmem_limit_bytes=None):
    # TODO(synk): for very wide K/N add a K grid axis ("arbitrary") with an
    #             f32 VMEM accumulator instead of loading the full (K,N) weight.
    M, K = x.shape
    _, N = w.shape
    if vmem_limit_bytes is None:
        vmem_limit_bytes = _default_vmem_limit()
    M_pad = _round_up(max(M, 8), 8)
    tm = min(tile_m, M_pad)
    M_pad = _round_up(M_pad, tm)          # only full blocks -> no partial tiles
    xp = _pad_axis(x, 0, M_pad).astype(jnp.bfloat16)
    grid = (M_pad // tm,)
    out = pl.pallas_call(
        _linear_tanh_kernel,
        out_shape=jax.ShapeDtypeStruct((M_pad, N), out_dtype),
        grid=grid,
        in_specs=[
            pl.BlockSpec((tm, K), lambda i: (i, 0)),
            _const_spec((K, N)),
            _const_spec((1, N)),
        ],
        out_specs=pl.BlockSpec((tm, N), lambda i: (i, 0)),
        compiler_params=pltpu.CompilerParams(
            dimension_semantics=("parallel",),
            vmem_limit_bytes=vmem_limit_bytes),
    )(xp, w.astype(jnp.bfloat16), b.reshape(1, N).astype(jnp.float32))
    return out[:M]


# ---------------------------------------------------------------------------
# Kernel 2: SymbolsDecoder (teacher-forced), one grid step per batch tile.
#   h_t      = tanh(emb_t @ W_ih + h_{t-1} @ W_hh + b_h)          (RNN cell)
#   attn     = softmax(h_t @ enc^T + mask)                        (attention)
#   ctx      = attn @ enc
#   out_t    = tanh(h_t @ W_oh + ctx @ W_oc + b_out)
#   scores_t = out_t @ [special_embed ; symbol_encodings]^T       (vocab score)
# Only h is carried through the recurrence; x@W_ih, attention, the output
# projection and vocab scoring are hoisted into big dense matmuls.
# ---------------------------------------------------------------------------
def _decoder_kernel(inp_ref, enc_ref, mask_ref, sym_ref, spec_t_ref,
                    w_ih_ref, w_hh_ref, b_h_ref,
                    w_oh_ref, w_oc_ref, b_out_ref,
                    o_spec_ref, o_sym_ref,
                    xw_ref, h_acc_ref):
    # inp_ref   : [T, Bt, D]   bf16  teacher-forced input embeds (time-major)
    # enc_ref   : [Bt, S, E]   bf16  encoder outputs
    # mask_ref  : [Bt, 1, S]   int8  1 = attend, 0 = masked
    # sym_ref   : [Bt, Vs, D]  bf16  per-example symbol encodings (lane-padded)
    # spec_t_ref: [D, Vp]      bf16  special-word embeds, pre-transposed
    # xw_ref    : [T, Bt, E]   f32   scratch: hoisted x @ W_ih
    # h_acc_ref : [T, Bt, E]   f32   scratch: per-step hidden states
    T, Bt, D = inp_ref.shape
    E = w_hh_ref.shape[1]

    w_hh = w_hh_ref[...]                                   # [E, E] bf16
    b_hb = jnp.broadcast_to(b_h_ref[...], (Bt, E))         # hoisted broadcast

    # --- hoisted input contribution of the RNN cell (M = T*Bt on the MXU) ---
    inp = inp_ref[...]                                     # [T, Bt, D] bf16
    xw = jnp.dot(inp.reshape(T * Bt, D), w_ih_ref[...],
                 preferred_element_type=jnp.float32)
    xw_ref[...] = xw.reshape(T, Bt, E)

    # --- recurrence: carry only h; dense (Bt, E) slab load/store per step ---
    def step(t, h):
        h_new = jnp.tanh(
            xw_ref[t]
            + jnp.dot(h.astype(w_hh.dtype), w_hh,
                      preferred_element_type=jnp.float32)
            + b_hb)                                        # [Bt, E] f32
        h_acc_ref[t] = h_new
        return h_new

    # TODO(synk): for large T use a partial unroll factor instead of full.
    jax.lax.fori_loop(0, T, step, jnp.zeros((Bt, E), jnp.float32), unroll=True)

    enc = enc_ref[...]                                     # [Bt, S, E] bf16
    # re-assemble hidden states batch-major (off the recurrence critical path)
    h_all = jnp.stack([h_acc_ref[t] for t in range(T)],
                      axis=1).astype(enc.dtype)            # [Bt, T, E] bf16

    # --- attention over encoder outputs, all steps at once ---
    mask_add = jnp.where(mask_ref[...] != 0, 0.0, -1e9).astype(jnp.float32)
    att = jnp.einsum('bte,bse->bts', h_all, enc,
                     preferred_element_type=jnp.float32)   # [Bt, T, S]
    # TODO(synk): when S >> T, reorient to put S on the matmul M axis.
    att = att + mask_add
    att = att - jnp.max(att, axis=-1, keepdims=True)
    p = jnp.exp(att)
    p = p * pl.reciprocal(jnp.sum(p, axis=-1, keepdims=True), approx=True)
    ctx = jnp.einsum('bts,bse->bte', p.astype(enc.dtype), enc,
                     preferred_element_type=jnp.float32)   # [Bt, T, E]

    # --- output projection (M = Bt*T) ---
    h2 = h_all.reshape(Bt * T, E)
    c2 = ctx.reshape(Bt * T, E).astype(w_oc_ref.dtype)
    out = jnp.tanh(
        jnp.dot(h2, w_oh_ref[...], preferred_element_type=jnp.float32)
        + jnp.dot(c2, w_oc_ref[...], preferred_element_type=jnp.float32)
        + b_out_ref[...])                                  # [Bt*T, D] f32
    ob = out.astype(spec_t_ref.dtype)

    # --- vocab scoring: special words (shared) + per-example symbols ---
    s_spec = jnp.dot(ob, spec_t_ref[...],
                     preferred_element_type=jnp.float32)   # [Bt*T, Vp]
    s_sym = jnp.einsum('btd,bvd->btv', ob.reshape(Bt, T, D), sym_ref[...],
                       preferred_element_type=jnp.float32)  # [Bt, T, Vs]

    # single dense (lane-aligned) stores
    o_spec_ref[...] = s_spec.reshape(Bt, T, -1)
    o_sym_ref[...] = s_sym


def _pick_b_tile(B, T, S, D, E, nsym_pad, nsp_pad, vmem_limit, b_tile_max=64):
    """Batch tile: as large as possible (MXU row occupancy, fewer grid steps)
    subject to a VMEM budget, then reduced once if that still leaves a
    single-step grid so the "parallel" axis can shard across both v7x TCs."""
    b_pad_min = _round_up(max(B, 8), 8)
    b = min(b_tile_max, b_pad_min)

    def tile_bytes(bt):
        streamed = bt * (T * D * 2             # teacher-forced inputs (bf16)
                         + S * E * 2           # encoder outputs (bf16)
                         + S                   # attention mask (int8)
                         + nsym_pad * D * 2    # symbol encodings (bf16)
                         + T * (nsp_pad + nsym_pad) * 4)   # f32 score slabs
        weights = (D * E + E * E + 2 * E * D + D * nsp_pad) * 2 + (E + D) * 4
        scratch = 2 * T * bt * E * 4           # xw + h state (f32)
        return 2 * streamed + weights + scratch  # 2x: pipeline double-buffering

    while b > 8 and tile_bytes(b) > 0.6 * vmem_limit:
        b //= 2
    while b >= 64 and pl.cdiv(b_pad_min, b) < 2:   # >=2 grid steps if possible
        b //= 2
    return max(8, (b // 8) * 8)


def symbols_decoder(inp_emb_tbd, enc_out, mask_i8, sym_enc_pad, special_t,
                    params, b_tile=None, vmem_limit_bytes=None):
    T, B, D = inp_emb_tbd.shape
    _, S, E = enc_out.shape
    NSYM_pad = sym_enc_pad.shape[1]
    NSP_pad = special_t.shape[1]

    if vmem_limit_bytes is None:
        vmem_limit_bytes = _default_vmem_limit()
    if b_tile is None:
        b_tile = _pick_b_tile(B, T, S, D, E, NSYM_pad, NSP_pad,
                              vmem_limit_bytes)
    B_pad = pl.cdiv(B, b_tile) * b_tile

    inp_emb_tbd = _pad_axis(inp_emb_tbd, 1, B_pad)
    enc_out = _pad_axis(enc_out, 0, B_pad)
    mask_i8 = _pad_axis(mask_i8, 0, B_pad)
    sym_enc_pad = _pad_axis(sym_enc_pad, 0, B_pad)

    grid = (B_pad // b_tile,)
    scores_spec, scores_sym = pl.pallas_call(
        _decoder_kernel,
        out_shape=(jax.ShapeDtypeStruct((B_pad, T, NSP_pad), jnp.float32),
                   jax.ShapeDtypeStruct((B_pad, T, NSYM_pad), jnp.float32)),
        grid=grid,
        in_specs=[
            pl.BlockSpec((T, b_tile, D), lambda b: (0, b, 0)),
            pl.BlockSpec((b_tile, S, E), lambda b: (b, 0, 0)),
            pl.BlockSpec((b_tile, 1, S), lambda b: (b, 0, 0)),
            pl.BlockSpec((b_tile, NSYM_pad, D), lambda b: (b, 0, 0)),
            _const_spec((D, NSP_pad)),
            _const_spec((D, E)),
            _const_spec((E, E)),
            _const_spec((1, E)),
            _const_spec((E, D)),
            _const_spec((E, D)),
            _const_spec((1, D)),
        ],
        out_specs=[
            pl.BlockSpec((b_tile, T, NSP_pad), lambda b: (b, 0, 0)),
            pl.BlockSpec((b_tile, T, NSYM_pad), lambda b: (b, 0, 0)),
        ],
        scratch_shapes=[pltpu.VMEM((T, b_tile, E), jnp.float32),
                        pltpu.VMEM((T, b_tile, E), jnp.float32)],
        compiler_params=pltpu.CompilerParams(
            dimension_semantics=("parallel",),
            vmem_limit_bytes=vmem_limit_bytes),
    )(inp_emb_tbd,
      enc_out,
      mask_i8,
      sym_enc_pad,
      special_t,
      params["w_ih"].astype(jnp.bfloat16),
      params["w_hh"].astype(jnp.bfloat16),
      params["b_h"].reshape(1, E).astype(jnp.float32),
      params["w_out_h"].astype(jnp.bfloat16),
      params["w_out_c"].astype(jnp.bfloat16),
      params["b_out"].reshape(1, D).astype(jnp.float32))
    return scores_spec[:B], scores_sym[:B]


# ---------------------------------------------------------------------------
# Model wrapper: PredictLogVarsModel.forward (simplified, training / teacher
# forcing with example-based target symbol indices).
# ---------------------------------------------------------------------------
def init_params(key, H, E, D, n_special):
    # NOTE: choose E, D as multiples of 256 (v6e/v7x MXU width; 128 ok on v5e)
    # so every kernel operand is lane-dense / MXU-tile aligned.
    ks = jax.random.split(key, 8)
    s = 0.1
    special = s * jax.random.normal(ks[0], (n_special, D), jnp.float32)
    special = special.at[0].set(0.0)  # nn.Embedding padding_idx=<PAD>(0)
    return {
        "w_enc": s * jax.random.normal(ks[1], (H, E), jnp.float32),
        "b_enc": jnp.zeros((E,), jnp.float32),
        "w_symenc": s * jax.random.normal(ks[2], (H, D), jnp.float32),
        "b_symenc": jnp.zeros((D,), jnp.float32),
        "special_embed": special,
        "w_ih": s * jax.random.normal(ks[3], (D, E), jnp.float32),
        "w_hh": s * jax.random.normal(ks[4], (E, E), jnp.float32),
        "b_h": jnp.zeros((E,), jnp.float32),
        "w_out_h": s * jax.random.normal(ks[5], (E, D), jnp.float32),
        "w_out_c": s * jax.random.normal(ks[6], (E, D), jnp.float32),
        "b_out": jnp.zeros((D,), jnp.float32),
    }


def predict_log_vars_forward(params, code_token_feats, symbol_feats,
                             encoder_mask, target_symbols_idxs):
    B, S, H = code_token_feats.shape
    _, n_sym, _ = symbol_feats.shape
    E = params["w_enc"].shape[1]
    D = params["w_symenc"].shape[1]
    n_special = params["special_embed"].shape[0]
    T = target_symbols_idxs.shape[1]

    # --- MethodCodeEncoder (simplified): per-token projection + tanh ---
    enc_out = linear_tanh(code_token_feats.reshape(B * S, H),
                          params["w_enc"], params["b_enc"]).reshape(B, S, E)
    # encoded_symbols -> all_symbols_encodings
    sym_enc = linear_tanh(symbol_feats.reshape(B * n_sym, H),
                          params["w_symenc"], params["b_symenc"]
                          ).reshape(B, n_sym, D)

    # lane-padded symbol encodings / special-word table (padded rows are zero
    # and sliced off below); special embeds passed once, pre-transposed.
    NSYM_pad = _round_up(n_sym, LANE_PAD)
    NSP_pad = _round_up(n_special, LANE_PAD)
    sym_enc_pad = _pad_axis(sym_enc, 1, NSYM_pad)                    # [B,Vs,D]
    special_pad = _pad_axis(params["special_embed"], 0, NSP_pad)     # [Vp,D]
    special_t = special_pad.T.astype(jnp.bfloat16)                   # [D,Vp]

    # teacher-forced decoder inputs: <SOS>(idx=1), then groundtruth[:-1]
    # (joint vocab = [special words ; symbols]; gather done as XLA glue)
    sos = jnp.full((B, 1), 1, dtype=target_symbols_idxs.dtype)
    prev_idx = jnp.concatenate([sos, target_symbols_idxs[:, :-1]], axis=1)
    is_special = prev_idx < n_special
    spec_idx = jnp.clip(prev_idx, 0, n_special - 1)
    sym_idx = jnp.clip(prev_idx - n_special, 0, n_sym - 1)
    spec_part = params["special_embed"][spec_idx]                    # [B,T,D]
    sym_part = jnp.take_along_axis(
        sym_enc.astype(jnp.float32), sym_idx[..., None], axis=1)     # [B,T,D]
    inp_emb = jnp.where(is_special[..., None], spec_part,
                        sym_part).astype(jnp.bfloat16)
    inp_emb_tbd = jnp.transpose(inp_emb, (1, 0, 2))                  # [T,B,D]

    # attention mask streamed as int8; additive -1e9 mask built in-kernel.
    # NOTE: fully-masked rows get uniform attention (only occurs in padded
    # batch rows, which are sliced off).
    mask_i8 = encoder_mask.astype(jnp.int8)[:, None, :]              # [B,1,S]

    scores_spec, scores_sym = symbols_decoder(
        inp_emb_tbd, enc_out, mask_i8, sym_enc_pad, special_t, params)

    # NOTE: downstream losses should prefer the two lane-padded score slabs
    # (returned below); the concat is an extra HBM pass over the largest
    # tensor and is kept only to match the reference [B, T, V] output layout.
    decoder_outputs = jnp.concatenate(
        [scores_spec[..., :n_special], scores_sym[..., :n_sym]], axis=-1)

    return {
        "decoder_outputs": decoder_outputs,                 # [B,T,n_special+n_sym]
        "decoder_scores_special_padded": scores_spec,       # [B,T,NSP_pad]
        "decoder_scores_symbols_padded": scores_sym,        # [B,T,NSYM_pad]
        "all_symbols_encodings": sym_enc.astype(jnp.float32),  # [B,n_sym,D]
    }


# ---------------------------------------------------------------------------
# Pure-JAX reference (mirrors the kernels' bf16 matmul operands / f32
# accumulation; softmax uses an exact reciprocal vs. the kernel's EUP approx).
# ---------------------------------------------------------------------------
def _reference_forward(params, code_token_feats, symbol_feats, encoder_mask,
                       target_symbols_idxs):
    f32, bf16 = jnp.float32, jnp.bfloat16
    B, S, H = code_token_feats.shape
    _, n_sym, _ = symbol_feats.shape
    n_special = params["special_embed"].shape[0]
    T = target_symbols_idxs.shape[1]

    def lt(x, w, b):
        y = jnp.dot(x.astype(bf16), w.astype(bf16), preferred_element_type=f32)
        return jnp.tanh(y + b).astype(bf16)

    enc_out = lt(code_token_feats.reshape(B * S, H), params["w_enc"],
                 params["b_enc"]).reshape(B, S, -1)
    sym_enc = lt(symbol_feats.reshape(B * n_sym, H), params["w_symenc"],
                 params["b_symenc"]).reshape(B, n_sym, -1)
    E = enc_out.shape[-1]

    sos = jnp.full((B, 1), 1, dtype=target_symbols_idxs.dtype)
    prev_idx = jnp.concatenate([sos, target_symbols_idxs[:, :-1]], axis=1)
    is_special = prev_idx < n_special
    spec_idx = jnp.clip(prev_idx, 0, n_special - 1)
    sym_idx = jnp.clip(prev_idx - n_special, 0, n_sym - 1)
    spec_part = params["special_embed"][spec_idx]
    sym_part = jnp.take_along_axis(sym_enc.astype(f32), sym_idx[..., None],
                                   axis=1)
    inp_emb = jnp.where(is_special[..., None], spec_part, sym_part).astype(bf16)

    w_ih, w_hh = params["w_ih"].astype(bf16), params["w_hh"].astype(bf16)
    w_oh, w_oc = params["w_out_h"].astype(bf16), params["w_out_c"].astype(bf16)
    b_h, b_out = params["b_h"].astype(f32), params["b_out"].astype(f32)

    xw = jnp.einsum('btd,de->bte', inp_emb, w_ih, preferred_element_type=f32)
    h = jnp.zeros((B, E), f32)
    hs = []
    for t in range(T):
        h = jnp.tanh(xw[:, t, :]
                     + jnp.dot(h.astype(bf16), w_hh, preferred_element_type=f32)
                     + b_h)
        hs.append(h)
    h_all = jnp.stack(hs, axis=1).astype(bf16)

    mask_add = jnp.where(encoder_mask[:, None, :], 0.0, -1e9).astype(f32)
    att = jnp.einsum('bte,bse->bts', h_all, enc_out, preferred_element_type=f32)
    att = att + mask_add
    att = att - jnp.max(att, axis=-1, keepdims=True)
    p = jnp.exp(att)
    p = p / jnp.sum(p, axis=-1, keepdims=True)
    ctx = jnp.einsum('bts,bse->bte', p.astype(bf16), enc_out,
                     preferred_element_type=f32)

    out = jnp.tanh(
        jnp.einsum('bte,ed->btd', h_all, w_oh, preferred_element_type=f32)
        + jnp.einsum('bte,ed->btd', ctx.astype(bf16), w_oc,
                     preferred_element_type=f32)
        + b_out).astype(bf16)
    s_spec = jnp.einsum('btd,vd->btv', out, params["special_embed"].astype(bf16),
                        preferred_element_type=f32)
    s_sym = jnp.einsum('btd,bvd->btv', out, sym_enc, preferred_element_type=f32)
    return jnp.concatenate([s_spec, s_sym], axis=-1), sym_enc.astype(f32)


if __name__ == "__main__":
    B, S, H = 2, 16, 128                   # batch, code-seq, token feature dim
    E = D = 256                            # enc-dim / symbol-dim (256-aligned)
    N_SYM, N_SPECIAL, T = 8, 4, 8          # symbols/example, special words, tgt steps

    key = jax.random.PRNGKey(0)
    k1, k2, k3, kp = jax.random.split(key, 4)
    code_token_feats = jax.random.normal(k1, (B, S, H), jnp.float32)
    symbol_feats = jax.random.normal(k2, (B, N_SYM, H), jnp.float32)
    encoder_mask = jnp.arange(S)[None, :] < jnp.array([[S], [S - 4]])   # [B,S]
    target_idxs = jax.random.randint(k3, (B, T), 0, N_SPECIAL + N_SYM)

    params = init_params(kp, H, E, D, N_SPECIAL)
    out = predict_log_vars_forward(params, code_token_feats, symbol_feats,
                                   encoder_mask, target_idxs)
    jax.block_until_ready(out["decoder_outputs"])
    jax.block_until_ready(out["all_symbols_encodings"])
    assert out["decoder_outputs"].shape == (B, T, N_SPECIAL + N_SYM)
    assert out["all_symbols_encodings"].shape == (B, N_SYM, D)
    assert bool(jnp.all(jnp.isfinite(out["decoder_outputs"])))

    # tolerance-asserted pure-JAX reference (loose tolerance absorbs the
    # approx softmax reciprocal and MXU accumulation-order differences).
    ref_scores, ref_sym_enc = _reference_forward(
        params, code_token_feats, symbol_feats, encoder_mask, target_idxs)
    assert bool(jnp.allclose(out["decoder_outputs"], ref_scores,
                             atol=5e-2, rtol=5e-2))
    assert bool(jnp.allclose(out["all_symbols_encodings"], ref_sym_enc,
                             atol=2e-2, rtol=2e-2))
    print("KERNEL_OK")
</pallas_src>

<mosaic_0001>
module attributes {stable_mosaic.version = 11 : i64} {
  func.func @_copy_kernel(%arg0: i32, %arg1: memref<8x128xf32, #tpu.memory_space<vmem>>, %arg2: memref<8x128xf32, #tpu.memory_space<vmem>>) attributes {dimension_semantics = [#tpu.dimension_semantics<arbitrary>], iteration_bounds = array<i64: 1>, scalar_prefetch = 0 : i64, scratch_operands = 0 : i64, tpu.core_type = #tpu.core_type<tc>, window_params = [{pipeline_mode = #tpu.pipeline_mode<synchronous>, transform_indices = @transform_0, window_bounds = array<i64: 8, 128>}, {pipeline_mode = #tpu.pipeline_mode<synchronous>, transform_indices = @transform_1, window_bounds = array<i64: 8, 128>}]} {
    %c0 = arith.constant 0 : index
    %c0_0 = arith.constant 0 : index
    %0 = vector.load %arg1[%c0, %c0_0] : memref<8x128xf32, #tpu.memory_space<vmem>>, vector<8x128xf32>
    %c0_1 = arith.constant 0 : index
    %c0_2 = arith.constant 0 : index
    %1 = vector.load %arg2[%c0_1, %c0_2] : memref<8x128xf32, #tpu.memory_space<vmem>>, vector<8x128xf32>
    tpu.vector_store %arg2[%c0_1, %c0_2], %0 {strides = array<i32>} : memref<8x128xf32, #tpu.memory_space<vmem>>, vector<8x128xf32>,
    return
  }
  func.func @transform_0(%arg0: i32) -> (i32, i32) {
    %c0_i32 = arith.constant 0 : i32
    %c0_i32_0 = arith.constant 0 : i32
    %c0_i32_1 = arith.constant 0 : i32
    return %c0_i32, %c0_i32_0 : i32, i32
  }
  func.func @transform_1(%arg0: i32) -> (i32, i32) {
    %c0_i32 = arith.constant 0 : i32
    %c0_i32_0 = arith.constant 0 : i32
    %c0_i32_1 = arith.constant 0 : i32
    return %c0_i32, %c0_i32_0 : i32, i32
  }
}

module attributes {stable_mosaic.version = 11 : i64} {
  func.func @_linear_tanh_kernel(%arg0: i32, %arg1: memref<32x128xbf16, #tpu.memory_space<vmem>>, %arg2: memref<128x256xbf16, #tpu.memory_space<vmem>>, %arg3: memref<1x256xf32, #tpu.memory_space<vmem>>, %arg4: memref<32x256xbf16, #tpu.memory_space<vmem>>) attributes {dimension_semantics = [#tpu.dimension_semantics<parallel>], iteration_bounds = array<i64: 1>, scalar_prefetch = 0 : i64, scratch_operands = 0 : i64, tpu.core_type = #tpu.core_type<tc>, window_params = [{transform_indices = @transform_0, window_bounds = array<i64: 32, 128>}, {pipeline_mode = #tpu.pipeline_mode<synchronous>, transform_indices = @transform_1, window_bounds = array<i64: 128, 256>}, {pipeline_mode = #tpu.pipeline_mode<synchronous>, transform_indices = @transform_2, window_bounds = array<i64: 1, 256>}, {transform_indices = @transform_3, window_bounds = array<i64: 32, 256>}]} {
    %c0 = arith.constant 0 : index
    %c0_0 = arith.constant 0 : index
    %0 = vector.load %arg1[%c0, %c0_0] : memref<32x128xbf16, #tpu.memory_space<vmem>>, vector<32x128xbf16>
    %c0_1 = arith.constant 0 : index
    %c0_2 = arith.constant 0 : index
    %1 = vector.load %arg2[%c0_1, %c0_2] : memref<128x256xbf16, #tpu.memory_space<vmem>>, vector<128x256xbf16>
    %cst = arith.constant dense<0.000000e+00> : vector<32x256xf32>
    %2 = tpu.matmul %0, %1, %cst {dimension_numbers = #tpu.dot_dimension_numbers<[1], [0], [0], [1], [0, 0, 1, 1], [], []>} : vector<32x128xbf16>, vector<128x256xbf16>, vector<32x256xf32> -> vector<32x256xf32>
    %c0_3 = arith.constant 0 : index
    %c0_4 = arith.constant 0 : index
    %3 = vector.load %arg3[%c0_3, %c0_4] : memref<1x256xf32, #tpu.memory_space<vmem>>, vector<1x256xf32>
    %4 = vector.broadcast %3 : vector<1x256xf32> to vector<32x256xf32>
    %5 = arith.addf %2, %4 : vector<32x256xf32>
    %6 = math.tanh %5 : vector<32x256xf32>
    %7 = arith.truncf %6 : vector<32x256xf32> to vector<32x256xbf16>
    %c0_5 = arith.constant 0 : index
    %c0_6 = arith.constant 0 : index
    %8 = vector.load %arg4[%c0_5, %c0_6] : memref<32x256xbf16, #tpu.memory_space<vmem>>, vector<32x256xbf16>
    tpu.vector_store %arg4[%c0_5, %c0_6], %7 {strides = array<i32>} : memref<32x256xbf16, #tpu.memory_space<vmem>>, vector<32x256xbf16>,
    return
  }
  func.func @transform_0(%arg0: i32) -> (i32, i32) {
    %c0_i32 = arith.constant 0 : i32
    %c0_i32_0 = arith.constant 0 : i32
    return %arg0, %c0_i32 : i32, i32
  }
  func.func @transform_1(%arg0: i32) -> (i32, i32) {
    %c0_i32 = arith.constant 0 : i32
    %c0_i32_0 = arith.constant 0 : i32
    %c0_i32_1 = arith.constant 0 : i32
    return %c0_i32, %c0_i32_0 : i32, i32
  }
  func.func @transform_2(%arg0: i32) -> (i32, i32) {
    %c0_i32 = arith.constant 0 : i32
    %c0_i32_0 = arith.constant 0 : i32
    %c0_i32_1 = arith.constant 0 : i32
    return %c0_i32, %c0_i32_0 : i32, i32
  }
  func.func @transform_3(%arg0: i32) -> (i32, i32) {
    %c0_i32 = arith.constant 0 : i32
    %c0_i32_0 = arith.constant 0 : i32
    return %arg0, %c0_i32 : i32, i32
  }
}

</mosaic_0001>

<bundles_post_ra>
// kernel: tpu_custom_call.1
= control target key start
LH: loop header
LB: loop body
LE: loop exit
PB: predicated region body
PF: predicated region fallthrough
CT: control target
= control target key end

     0   :  { %6 = vsyncpa [#allocation3], 0  ;;  %s124_s0 = inlined_call_operand.hbm [shape: f32[8,128], index: 0, kind: input, shape index: {}]   ;;  %s125_s1 = inlined_call_operand.hbm [shape: f32[8,128], index: 1, kind: output, shape index: {}]  }
   0x1   :  { %7 = vsyncpa [#allocation4], 0  ;;  %s88_s6 = smov [#allocation2]   ;;  %s40_s10 = scalar_lea.hbm %s124_s0, 128 }
   0x2   :  { %s14_s7 = sshll.u32 %s88_s6, 4  ;;  %p41_p0 = scmp.ne.s32.totalorder %s124_s0, %s40_s10  ;;  %s15_s7 = int_to_ptr.vmem [resolvable:$true] %s14_s7 }
   0x3   :  { %p44_p1 = scmp.lt.u32.totalorder %s40_s10, %s124_s0 }
   0x5   :  { %p46_p2 = pnand %p44_p1, %p41_p0 }
   0x7   :  { %49 = shalt.err (!%p46_p2)
}
   0x8   :  { %s50_s15 = scalar_lea.vmem %s15_s7, 128  ;;  %p55_p4 = scmp.lt.s32.totalorder %s15_s7, %s15_s7 }
   0x9   :  { %p51_p3 = scmp.ne.s32.totalorder %s15_s7, %s50_s15  ;;  %p56_p5 = scmp.lt.s32.totalorder %s50_s15, %s50_s15 }
   0xb   :  { %p57_p6 = por %p56_p5, %p55_p4 }
   0xd   :  { %p58_p7 = pnand %p57_p6, %p51_p3 }
   0xf   :  { %61 = shalt.err (!%p58_p7)
}
  0x10   :  { %17 = dma.hbm_to_vmem [thread:$0]  %s124_s0, 128, %s15_s7, [#allocation3]  }
  0x11   :  { %84 = dma.done.wait [#allocation3], 128  }
  0x12   :  { %85 = vsyncadd [#allocation3], 4294967168  ;;  %s89_s18 = smov [#allocation5]   ;;  %v21_v0 = vld [vmem:[#allocation2] sm:$0xff] }
  0x13   :  { %s29_s19 = sshll.u32 %s89_s18, 4  ;;  %22 = vst [vmem:[#allocation5] sm:$0xff] %v21_v0  ;;  %s30_s19 = int_to_ptr.vmem [resolvable:$true] %s29_s19 }
  0x14   :  { %s62_s20 = scalar_lea.vmem %s30_s19, 128  ;;  %p67_p9 = scmp.lt.s32.totalorder %s30_s19, %s30_s19 }
  0x15   :  { %p63_p8 = scmp.ne.s32.totalorder %s30_s19, %s62_s20  ;;  %p68_p10 = scmp.lt.s32.totalorder %s62_s20, %s62_s20 }
  0x17   :  { %p69_p11 = por %p68_p10, %p67_p9 }
  0x19   :  { %p70_p12 = pnand %p69_p11, %p63_p8 }
  0x1b   :  { %73 = shalt.err (!%p70_p12)
}
  0x1c   :  { %s74_s23 = scalar_lea.hbm %s125_s1, 128 }
  0x1d   :  { %p75_p13 = scmp.ne.s32.totalorder %s125_s1, %s74_s23  ;;  %p78_p0 = scmp.lt.u32.totalorder %s74_s23, %s125_s1 }
  0x1f   :  { %p80_p1 = pnand %p78_p0, %p75_p13 }
  0x21   :  { %83 = shalt.err (!%p80_p1)
}
  0x22   :  { %32 = dma.vmem_to_hbm [thread:$0]  %s30_s19, 128, %s125_s1, [#allocation4]  }
  0x23   :  { %86 = dma.done.wait [#allocation4], 128  }
  0x24   :  { %87 = vsyncadd [#allocation4], 4294967168 }
  0x25   :  { %36 = vsyncpa [#allocation3], 1 }
  0x26   :  { %37 = vsyncpa [#allocation4], 1 }

// kernel: tpu_custom_call.1
= control target key start
LH: loop header
LB: loop body
LE: loop exit
PB: predicated region body
PF: predicated region fallthrough
CT: control target
= control target key end

     0   :  { %8 = vsyncpa [#allocation3], 0  ;;  %s512_s0 = inlined_call_operand.hbm [shape: bf16[32,128], index: 0, kind: input, shape index: {}]   ;;  %s513_s1 = inlined_call_operand.hbm [shape: bf16[128,256], index: 1, kind: input, shape index: {}]   ;;  %s514_s2 = inlined_call_operand.vmem [shape: f32[1,256], index: 2, kind: input, shape index: {}]   ;;  %s515_s3 = inlined_call_operand.hbm [shape: bf16[32,256], index: 3, kind: output, shape index: {}]  }
   0x1   :  { %9 = vsyncpa [#allocation6], 0 }
   0x2   :  { %10 = vsyncpa [#allocation4], 0  ;;  %s439_s12 = smov [#allocation2]   ;;  %s367_s16 = scalar_lea.hbm %s512_s0, 256 }
   0x3   :  { %s16_s13 = sshll.u32 %s439_s12, 4  ;;  %p368_p0 = scmp.ne.s32.totalorder %s512_s0, %s367_s16  ;;  %s17_s13 = int_to_ptr.vmem [resolvable:$true] %s16_s13 }
   0x4   :  { %p371_p1 = scmp.lt.u32.totalorder %s367_s16, %s512_s0 }
   0x6   :  { %p373_p2 = pnand %p371_p1, %p368_p0 }
   0x8   :  { %376 = shalt.err (!%p373_p2)
}
   0x9   :  { %s377_s21 = scalar_lea.vmem %s17_s13, 256  ;;  %p382_p4 = scmp.lt.s32.totalorder %s17_s13, %s17_s13 }
   0xa   :  { %p378_p3 = scmp.ne.s32.totalorder %s17_s13, %s377_s21  ;;  %p383_p5 = scmp.lt.s32.totalorder %s377_s21, %s377_s21 }
   0xc   :  { %p384_p6 = por %p383_p5, %p382_p4 }
   0xe   :  { %p385_p7 = pnand %p384_p6, %p378_p3 }
  0x10   :  { %388 = shalt.err (!%p385_p7)
}
  0x11   :  { %s440_s22 = smov 64   ;;  %s441_s23 = smov 4  }
  0x12   :  { %22 = dma.hbm_to_vmem [thread:$0]  %s512_s0, 256, %s17_s13, [#allocation3], %s440_s22, %s440_s22, %s441_s23  }
  0x13   :  { %s442_s26 = smov [#allocation5]   ;;  %s389_s30 = scalar_lea.hbm %s513_s1, 2048 }
  0x14   :  { %s28_s27 = sshll.u32 %s442_s26, 4  ;;  %p390_p8 = scmp.ne.s32.totalorder %s513_s1, %s389_s30  ;;  %s29_s27 = int_to_ptr.vmem [resolvable:$true] %s28_s27 }
  0x15   :  { %p393_p9 = scmp.lt.u32.totalorder %s389_s30, %s513_s1 }
  0x17   :  { %p395_p10 = pnand %p393_p9, %p390_p8 }
  0x19   :  { %398 = shalt.err (!%p395_p10)
}
  0x1a   :  { %s399_s8 = scalar_lea.vmem %s29_s27, 2048  ;;  %p404_p12 = scmp.lt.s32.totalorder %s29_s27, %s29_s27 }
  0x1b   :  { %p400_p11 = scmp.ne.s32.totalorder %s29_s27, %s399_s8  ;;  %p405_p13 = scmp.lt.s32.totalorder %s399_s8, %s399_s8 }
  0x1d   :  { %p406_p0 = por %p405_p13, %p404_p12 }
  0x1f   :  { %p407_p1 = pnand %p406_p0, %p400_p11 }
  0x21   :  { %410 = shalt.err (!%p407_p1)
}
  0x22   :  { %s443_s0 = smov 128   ;;  %s444_s9 = smov 8  }
  0x23   :  { %34 = dma.hbm_to_vmem [thread:$0]  %s513_s1, 2048, %s29_s27, [#allocation6], %s443_s0, %s443_s0, %s444_s9  }
  0x24   :  { %433 = dma.done.wait [#allocation3], 256  }
  0x25   :  { %434 = vsyncadd [#allocation3], 4294967040 }
  0x26   :  { %435 = dma.done.wait [#allocation6], 2048  }
  0x27   :  { %436 = vsyncadd [#allocation6], 4294965248  ;;  %v445_v0 = vmov 0   ;;  %v325_v1 = vld [vmem:[#allocation5 + $0x4] ss:$8 sps:$4 sm:$0xff]   ;;  %v349_v17 = vld [vmem:[#allocation2] sm:$0xff]   ;;  %v66_v19 = vlaneseq }
  0x28   :  { %200 = vmatprep.mubr.bf16.mxu0 %v445_v0  ;;  %210 = vmatprep.mubr.bf16.mxu1 %v445_v0  ;;  %v327_v2 = vld [vmem:[#allocation5] ss:$8 sps:$4 sm:$0xff]   ;;  %v328_v3 = vld [vmem:[#allocation5 + $0x14] ss:$8 sps:$4 sm:$0xff]   ;;  %v330_v4 = vld [vmem:[#allocation5 + $0x10] ss:$8 sps:$4 sm:$0xff]  }
  0x29   :  { %168 = vmatprep.subr.bf16.mxu0 %v325_v1  ;;  %301 = vmatprep.subr.bf16.mxu1 %v325_v1  ;;  %v331_v5 = vld [vmem:[#allocation5 + $0x24] ss:$8 sps:$4 sm:$0xff]   ;;  %v333_v6 = vld [vmem:[#allocation5 + $0x20] ss:$8 sps:$4 sm:$0xff]   ;;  %v334_v7 = vld [vmem:[#allocation5 + $0x34] ss:$8 sps:$4 sm:$0xff]  }
  0x2a   :  { %169 = vmatpush1.bf16.msra.mxu0 %v327_v2  ;;  %309 = vmatpush1.bf16.msra.mxu1 %v327_v2  ;;  %v336_v8 = vld [vmem:[#allocation5 + $0x30] ss:$8 sps:$4 sm:$0xff]   ;;  %v337_v9 = vld [vmem:[#allocation5 + $0x44] ss:$8 sps:$4 sm:$0xff]   ;;  %v339_v10 = vld [vmem:[#allocation5 + $0x40] ss:$8 sps:$4 sm:$0xff]  }
  0x2b   :  { %170 = vmatprep.subr.bf16.mxu0 %v328_v3  ;;  %302 = vmatprep.subr.bf16.mxu1 %v328_v3  ;;  %v340_v11 = vld [vmem:[#allocation5 + $0x54] ss:$8 sps:$4 sm:$0xff]   ;;  %v342_v12 = vld [vmem:[#allocation5 + $0x50] ss:$8 sps:$4 sm:$0xff]   ;;  %v343_v13 = vld [vmem:[#allocation5 + $0x64] ss:$8 sps:$4 sm:$0xff]  }
  0x2c   :  { %v345_v14 = vld [vmem:[#allocation5 + $0x60] ss:$8 sps:$4 sm:$0xff]   ;;  %v346_v15 = vld [vmem:[#allocation5 + $0x74] ss:$8 sps:$4 sm:$0xff]   ;;  %v348_v16 = vld [vmem:[#allocation5 + $0x70] ss:$8 sps:$4 sm:$0xff]  }
  0x2d   :  { %v350_v18 = vld [vmem:[#allocation2 + $0x8] sm:$0xff]   ;;  %v67_v20 = vshrl.u32 %v66_v19, 7  ;;  %v64_v22 = vld [vmem:[%s514_s2] sm:$0x3]  ;;  %s446_s2 = smov [#allocation7]  }
  0x2e   :  { %171 = vmatpush1.bf16.msra.mxu0 %v330_v4  ;;  %310 = vmatpush1.bf16.msra.mxu1 %v330_v4  ;;  %s262_s13 = sshll.u32 %s446_s2, 4  ;;  %s263_s13 = int_to_ptr.vmem [resolvable:$true] %s262_s13 }
  0x2f   :  { %172 = vmatprep.subr.bf16.mxu0 %v331_v5  ;;  %303 = vmatprep.subr.bf16.mxu1 %v331_v5  ;;  %v68_v21 = vsub.s32 0, %v67_v20  ;;  %v72_v23 = vsub.s32 1, %v67_v20  ;;  %s411_s14 = scalar_lea.vmem %s263_s13, 512  ;;  %p416_p3 = scmp.lt.s32.totalorder %s263_s13, %s263_s13 }
  0x30   :  { %p412_p2 = scmp.ne.s32.totalorder %s263_s13, %s411_s14  ;;  %p417_p4 = scmp.lt.s32.totalorder %s411_s14, %s411_s14 }
  0x31   :  { %v69_v24 = vrot.slane %v64_v22, %v68_v21  ;;  %v73_v25 = vrot.slane %v64_v22, %v72_v23 }
  0x32   :  { %173 = vmatpush1.bf16.msra.mxu0 %v333_v6  ;;  %311 = vmatpush1.bf16.msra.mxu1 %v333_v6  ;;  %p418_p5 = por %p417_p4, %p416_p3 }
  0x33   :  { %174 = vmatprep.subr.bf16.mxu0 %v334_v7  ;;  %304 = vmatprep.subr.bf16.mxu1 %v334_v7 }
  0x34   :  { %p419_p6 = pnand %p418_p5, %p412_p2 }
  0x36   :  { %175 = vmatpush1.bf16.msra.mxu0 %v336_v8  ;;  %312 = vmatpush1.bf16.msra.mxu1 %v336_v8 }
  0x37   :  { %176 = vmatprep.subr.bf16.mxu0 %v337_v9  ;;  %305 = vmatprep.subr.bf16.mxu1 %v337_v9 }
  0x3a   :  { %177 = vmatpush1.bf16.msra.mxu0 %v339_v10  ;;  %313 = vmatpush1.bf16.msra.mxu1 %v339_v10 }
  0x3b   :  { %178 = vmatprep.subr.bf16.mxu0 %v340_v11  ;;  %306 = vmatprep.subr.bf16.mxu1 %v340_v11 }
  0x3e   :  { %179 = vmatpush1.bf16.msra.mxu0 %v342_v12  ;;  %314 = vmatpush1.bf16.msra.mxu1 %v342_v12 }
  0x3f   :  { %180 = vmatprep.subr.bf16.mxu0 %v343_v13  ;;  %307 = vmatprep.subr.bf16.mxu1 %v343_v13 }
  0x42   :  { %181 = vmatpush1.bf16.msra.mxu0 %v345_v14  ;;  %315 = vmatpush1.bf16.msra.mxu1 %v345_v14 }
  0x43   :  { %182 = vmatprep.subr.bf16.mxu0 %v346_v15  ;;  %308 = vmatprep.subr.bf16.mxu1 %v346_v15 }
  0x46   :  { %183 = vmatpush1.bf16.msra.mxu0 %v348_v16  ;;  %316 = vmatpush1.bf16.msra.mxu1 %v348_v16 }
  0x49   :  { %201 = vmatmul.mubr.bf16.vlgmr.msra.gmra.mrb[0].mxu0 %v349_v17  ;;  %211 = vmatmul.mubr.bf16.vlgmr.msra.gmra.mrb[0].mxu1 %v350_v18 }
 0x11c   :  { %v202_v26 = vpop.f32.mrb[0].mxu0  ;;  %v212_v27 = vpop.f32.mrb[0].mxu1 }
 0x11d   :  { %v203_v28 = vadd.f32 %v202_v26, %v69_v24  ;;  %v213_v29 = vadd.f32 %v212_v27, %v69_v24  ;;  %v204_v30 = vpop.f32.mrb[1].mxu0  ;;  %v214_v31 = vpop.f32.mrb[1].mxu1 }
 0x11e   :  { %v205_v32 = vadd.f32 %v204_v30, %v73_v25  ;;  %v215_v33 = vadd.f32 %v214_v31, %v73_v25  ;;  %v206_v34 = vpop.f32.mrb[2].mxu0  ;;  %v216_v35 = vpop.f32.mrb[2].mxu1 }
 0x11f   :  { %351 = vtanh.f32 %v203_v28  ;;  %v207_v36 = vadd.f32 %v206_v34, %v69_v24  ;;  %v208_v37 = vpop.f32.mrb[3].mxu0  ;;  %v218_v38 = vpop.f32.mrb[3].mxu1  ;;  %v217_v39 = vadd.f32 %v216_v35, %v69_v24 }
 0x120   :  { %353 = vtanh.f32 %v213_v29  ;;  %v209_v40 = vadd.f32 %v208_v37, %v73_v25  ;;  %v219_v41 = vadd.f32 %v218_v38, %v73_v25 }
 0x121   :  { %355 = vtanh.f32 %v205_v32 }
 0x122   :  { %357 = vtanh.f32 %v215_v33 }
 0x123   :  { %359 = vtanh.f32 %v207_v36 }
 0x124   :  { %361 = vtanh.f32 %v217_v39 }
 0x125   :  { %363 = vtanh.f32 %v209_v40 }
 0x126   :  { %365 = vtanh.f32 %v219_v41 }
 0x129   :  { %v352_v42 = vpop.eup %351 }
 0x12a   :  { %v354_v43 = vpop.eup %353 }
 0x12b   :  { %v356_v44 = vpop.eup %355 }
 0x12c   :  { %v358_v45 = vpop.eup %357  ;;  %v297_v46 = vpack.c.bf16 %v356_v44, %v352_v42 }
 0x12d   :  { %v360_v47 = vpop.eup %359  ;;  %v299_v48 = vpack.c.bf16 %v358_v45, %v354_v43 }
 0x12e   :  { %v362_v49 = vpop.eup %361  ;;  %253 = vst [vmem:[#allocation7] sm:$0xff] %v297_v46 }
 0x12f   :  { %v364_v50 = vpop.eup %363  ;;  %255 = vst [vmem:[#allocation7 + $0x10] sm:$0xff] %v299_v48 }
 0x130   :  { %v366_v51 = vpop.eup %365  ;;  %v298_v52 = vpack.c.bf16 %v364_v50, %v360_v47 }
 0x131   :  { %v300_v53 = vpack.c.bf16 %v366_v51, %v362_v49 }
 0x132   :  { %254 = vst [vmem:[#allocation7 + $0x8] sm:$0xff] %v298_v52 }
 0x133   :  { %256 = vst [vmem:[#allocation7 + $0x18] sm:$0xff] %v300_v53 }
 0x134   :  { %422 = shalt.err (!%p419_p6)
}
 0x135   :  { %s423_s17 = scalar_lea.hbm %s515_s3, 512 }
 0x136   :  { %p424_p7 = scmp.ne.s32.totalorder %s515_s3, %s423_s17  ;;  %p427_p8 = scmp.lt.u32.totalorder %s423_s17, %s515_s3 }
 0x138   :  { %p429_p9 = pnand %p427_p8, %p424_p7 }
 0x13a   :  { %432 = shalt.err (!%p429_p9)
}
 0x13b   :  { %268 = dma.vmem_to_hbm [thread:$0]  %s263_s13, 512, %s515_s3, [#allocation4], %s443_s0, %s443_s0, %s444_s9  }
 0x13c   :  { %437 = dma.done.wait [#allocation4], 512  }
 0x13d   :  { %438 = vsyncadd [#allocation4], 4294966784 }
 0x13e   :  { %272 = vsyncpa [#allocation3], 1 }
 0x13f   :  { %273 = vsyncpa [#allocation6], 1 }
 0x140   :  { %274 = vsyncpa [#allocation4], 1 }

</bundles_post_ra>
